<compile_context>
chip_gen: v7x
topology: tpu7x:2x2x1
jax: 0.10.0
libtpu: 0.0.40
codegen_flags: <defaults>
</compile_context>

<pallas_src>
import functools

import jax
import jax.numpy as jnp
from jax.experimental import pallas as pl
from jax.experimental.pallas import tpu as pltpu

LANES = 128  # vreg lane width


def _round_up(n, m):
    return ((n + m - 1) // m) * m


def _tpu_generation():
    """Best-effort TPU generation from the device kind string."""
    try:
        kind = jax.devices()[0].device_kind.lower()
    except Exception:
        return "unknown"
    if "v7" in kind:
        return "v7x"
    if "v6" in kind or "trillium" in kind:
        return "v6e"
    if "v5 lite" in kind or "v5lite" in kind or "v5e" in kind:
        return "v5e"
    return "unknown"


# Row-tile size per generation.  Per-step DMA = 2 inputs * tm*128*itemsize.
#   v5e : 2048 ->  4 MiB double-buffered (16 MiB scoped-VMEM default)
#   v6e : 4096 ->  8 MiB double-buffered (32 MiB default)
#   v7x : 8192 -> 16 MiB double-buffered (32 MiB default); amortizes the
#         ~0.35us per-grid-step overhead against 3.2 TB/s HBM.
_TM_BY_GEN = {"v5e": 2048, "v6e": 4096, "v7x": 8192, "unknown": 2048}


def _wbce_kernel(x_ref, t_ref, out_ref, acc_ref, *,
                 pos_w, neg_w, tm, blocks_per_part, blocks_total, rows_full,
                 needs_mask, binary_targets):
    """One grid step: weighted BCE on a (tm,128) tile folded into an (8,128) accumulator."""
    p = pl.program_id(0)   # partition (CORE_PARALLEL across v7x TensorCores)
    j = pl.program_id(1)   # block within the partition (sequential reduction)

    @pl.when(j == 0)
    def _init():
        acc_ref[...] = jnp.zeros_like(acc_ref)

    x = x_ref[...].astype(jnp.float32)
    t = t_ref[...].astype(jnp.float32)
    x = jnp.clip(x, 1e-7, 1.0 - 1e-7)

    if binary_targets:
        # Exact for t in {0,1}: one EUP log + selects instead of two logs.
        pos = t > 0.5
        loss = jnp.where(pos, pos_w, neg_w) * jnp.log(jnp.where(pos, x, 1.0 - x))
    else:
        # Faithful to the PyTorch module (also valid for soft targets).
        loss = neg_w * (1.0 - t) * jnp.log(1.0 - x) + pos_w * t * jnp.log(x)

    def _fold(v):
        # (tm,128) -> (8,128): sublane-tile-aligned reshape, pure VPU vreg adds.
        return v.reshape(tm // 8, 8, LANES).sum(axis=0)

    if not needs_mask:
        acc_ref[...] += _fold(loss)
    else:
        gb = p * blocks_per_part + j   # global block index

        @pl.when(gb != blocks_total - 1)
        def _full_block():
            acc_ref[...] += _fold(loss)

        @pl.when(gb == blocks_total - 1)
        def _boundary_block():
            # Last block reaches past the final full 128-lane row: mask those rows.
            row = gb * tm + jax.lax.broadcasted_iota(jnp.int32, (tm, LANES), 0)
            acc_ref[...] += _fold(jnp.where(row < rows_full, loss, 0.0))

    @pl.when(j == pl.num_programs(1) - 1)
    def _finalize():
        out_ref[...] = acc_ref[...]   # single unmasked (8,128) store


def _loss_sum_f32(x, t, pos_w, neg_w):
    """Pure-jnp weighted-BCE partial sum (only used for the <128-element tail)."""
    xf = jnp.clip(x.astype(jnp.float32), 1e-7, 1.0 - 1e-7)
    tf = t.astype(jnp.float32)
    loss = neg_w * (1.0 - tf) * jnp.log(1.0 - xf) + pos_w * tf * jnp.log(xf)
    return jnp.sum(loss, dtype=jnp.float32)


def _weighted_bce_core(inputs, targets, pos_w, neg_w, *, tm=None,
                       assume_binary_targets=False):
    """-mean(neg_w*(1-t)*log(1-x) + pos_w*t*log(x)) with x = clamp(inputs, 1e-7, 1-1e-7)."""
    total = int(inputs.size)
    gen = _tpu_generation()
    if tm is None:
        tm = _TM_BY_GEN[gen]

    x_flat = inputs.reshape(-1)
    t_flat = targets.reshape(-1)

    rows_full = total // LANES          # number of complete 128-lane rows
    main_elems = rows_full * LANES

    kernel_sum = jnp.float32(0.0)
    if rows_full > 0:
        # Sub-32-bit operands pack 2x/4x rows per sublane; keep tm a multiple of
        # the packed sublane tile so blocks stay layout-aligned.
        itemsize = min(inputs.dtype.itemsize, targets.dtype.itemsize)
        sub = 8 * max(1, 4 // max(1, int(itemsize)))
        tm = max(sub, min(int(tm), _round_up(rows_full, sub)))

        blocks_total = pl.cdiv(rows_full, tm)
        # Megacore split: v7x only (2 TensorCores), and only when the block count
        # splits evenly so no partition ever addresses an out-of-range block.
        # Single-TC chips keep P=1 (no extra init/finalize or pipeline bubble).
        P = 2 if (gen == "v7x" and blocks_total >= 8 and blocks_total % 2 == 0) else 1
        blocks_per_part = blocks_total // P

        if total == main_elems:
            x2 = x_flat.reshape(rows_full, LANES)   # metadata-only reshape, no copy
            t2 = t_flat.reshape(rows_full, LANES)
        else:
            # TODO(synk): this prefix slice can cost one extra HBM pass when the flat
            # size is not a multiple of 128; the <128-element tail is folded in below
            # with a tiny jnp reduction so the hot loop stays mask-free except for the
            # single boundary block.
            x2 = x_flat[:main_elems].reshape(rows_full, LANES)
            t2 = t_flat[:main_elems].reshape(rows_full, LANES)

        kernel = functools.partial(
            _wbce_kernel,
            pos_w=float(pos_w), neg_w=float(neg_w), tm=tm,
            blocks_per_part=blocks_per_part, blocks_total=blocks_total,
            rows_full=rows_full, needs_mask=(rows_full % tm) != 0,
            binary_targets=bool(assume_binary_targets))

        if P > 1:
            # Real 2-TensorCore sharding on v7x (plain "parallel" is a near no-op).
            dim_sem = (pltpu.CORE_PARALLEL, pltpu.ARBITRARY)
        else:
            dim_sem = ("arbitrary", "arbitrary")

        partials = pl.pallas_call(
            kernel,
            out_shape=jax.ShapeDtypeStruct((P * 8, LANES), jnp.float32),
            grid_spec=pltpu.PrefetchScalarGridSpec(
                num_scalar_prefetch=0,
                grid=(P, blocks_per_part),
                in_specs=[
                    pl.BlockSpec((tm, LANES), lambda p, j: (p * blocks_per_part + j, 0)),
                    pl.BlockSpec((tm, LANES), lambda p, j: (p * blocks_per_part + j, 0)),
                ],
                out_specs=pl.BlockSpec((8, LANES), lambda p, j: (p, 0)),
                scratch_shapes=[pltpu.VMEM((8, LANES), jnp.float32)],
            ),
            compiler_params=pltpu.CompilerParams(dimension_semantics=dim_sem),
        )(x2, t2)
        kernel_sum = jnp.sum(partials, dtype=jnp.float32)

    if main_elems < total:
        tail_sum = _loss_sum_f32(x_flat[main_elems:], t_flat[main_elems:],
                                 float(pos_w), float(neg_w))
    else:
        tail_sum = jnp.float32(0.0)

    return -(kernel_sum + tail_sum) / jnp.float32(total)


def weighted_bce_loss(inputs, targets, pos_weight=None, neg_weight=None, *,
                      tm=None, assume_binary_targets=False):
    """Pallas implementation of WeightedBCELoss(pos_weight, neg_weight).forward."""
    if pos_weight is None and neg_weight is None:
        # Module: loss = F.binary_cross_entropy(x, t, 'mean'); return -mean(loss).
        # BCE_mean equals the pos_w=neg_w=1 weighted result, so negate it once more.
        return -_weighted_bce_core(inputs, targets, 1.0, 1.0, tm=tm,
                                   assume_binary_targets=assume_binary_targets)
    pos_w = 0.0 if pos_weight is None else float(pos_weight)
    neg_w = 0.0 if neg_weight is None else float(neg_weight)
    return _weighted_bce_core(inputs, targets, pos_w, neg_w, tm=tm,
                              assume_binary_targets=assume_binary_targets)


def _reference(inputs, targets, pos_weight=None, neg_weight=None):
    x = jnp.clip(inputs.astype(jnp.float32), 1e-7, 1.0 - 1e-7)
    t = targets.astype(jnp.float32)
    if pos_weight is not None and neg_weight is not None:
        loss = neg_weight * (1.0 - t) * jnp.log(1.0 - x) + pos_weight * t * jnp.log(x)
    elif pos_weight is not None:
        loss = pos_weight * t * jnp.log(x)
    elif neg_weight is not None:
        loss = neg_weight * (1.0 - t) * jnp.log(1.0 - x)
    else:
        loss = jnp.mean(-(t * jnp.log(x) + (1.0 - t) * jnp.log(1.0 - x)))
    return -jnp.mean(loss)


if __name__ == "__main__":
    root = jax.random.PRNGKey(0)

    def run_case(shape, dtype, pos_w, neg_w, binary, key):
        k1, k2 = jax.random.split(key)
        inputs = jax.random.uniform(k1, shape, dtype=jnp.float32,
                                    minval=0.01, maxval=0.99).astype(dtype)
        targets = jax.random.bernoulli(k2, p=0.3, shape=shape).astype(dtype)
        out = weighted_bce_loss(inputs, targets, pos_w, neg_w,
                                assume_binary_targets=binary)
        out = jax.block_until_ready(out)
        ref = _reference(inputs, targets, pos_w, neg_w)
        assert jnp.allclose(out, ref, rtol=1e-5, atol=1e-6), (shape, dtype, out, ref)

    keys = jax.random.split(root, 4)
    # 1) Module-shaped case: both weights, f32, 128-aligned flat size (pure reshape path).
    run_case((2, 4, 16, 16), jnp.float32, 2.0, 0.5, False, keys[0])
    # 2) Non-128-aligned flat size: masked boundary block + tiny jnp tail fold.
    run_case((2, 3, 17, 19), jnp.float32, 2.0, 0.5, False, keys[1])
    # 3) bf16 operands (half the HBM traffic) + binary-target single-log path.
    run_case((2, 4, 16, 16), jnp.bfloat16, 2.0, 0.5, True, keys[2])
    # 4) pos_weight-only branch of the module.
    run_case((2, 4, 16, 16), jnp.float32, 2.0, None, False, keys[3])

    print("KERNEL_OK")
</pallas_src>

<mosaic_0001>
module attributes {stable_mosaic.version = 11 : i64} {
  func.func @_wbce_kernel(%arg0: i32, %arg1: i32, %arg2: memref<16x128xf32, #tpu.memory_space<vmem>>, %arg3: memref<16x128xf32, #tpu.memory_space<vmem>>, %arg4: memref<8x128xf32, #tpu.memory_space<vmem>>, %arg5: memref<8x128xf32, #tpu.memory_space<vmem>>) attributes {dimension_semantics = [#tpu.dimension_semantics<arbitrary>, #tpu.dimension_semantics<arbitrary>], iteration_bounds = array<i64: 1, 1>, scalar_prefetch = 0 : i64, scratch_operands = 1 : i64, tpu.core_type = #tpu.core_type<tc>, window_params = [{transform_indices = @transform_0, window_bounds = array<i64: 16, 128>}, {transform_indices = @transform_1, window_bounds = array<i64: 16, 128>}, {transform_indices = @transform_2, window_bounds = array<i64: 8, 128>}]} {
    %c0_i32 = arith.constant 0 : i32
    %0 = arith.cmpi eq, %arg1, %c0_i32 : i32
    %1 = arith.extui %0 : i1 to i32
    %c0_i32_0 = arith.constant 0 : i32
    %2 = arith.cmpi ne, %1, %c0_i32_0 : i32
    scf.if %2 {
      %cst_16 = arith.constant 0.000000e+00 : f32
      %30 = vector.broadcast %cst_16 : f32 to vector<8x128xf32>
      %c0_17 = arith.constant 0 : index
      %c0_18 = arith.constant 0 : index
      %31 = vector.load %arg5[%c0_17, %c0_18] : memref<8x128xf32, #tpu.memory_space<vmem>>, vector<8x128xf32>
      tpu.vector_store %arg5[%c0_17, %c0_18], %30 {strides = array<i32>} : memref<8x128xf32, #tpu.memory_space<vmem>>, vector<8x128xf32>,
    } else {
    }
    %c0 = arith.constant 0 : index
    %c0_1 = arith.constant 0 : index
    %3 = vector.load %arg2[%c0, %c0_1] : memref<16x128xf32, #tpu.memory_space<vmem>>, vector<16x128xf32>
    %c0_2 = arith.constant 0 : index
    %c0_3 = arith.constant 0 : index
    %4 = vector.load %arg3[%c0_2, %c0_3] : memref<16x128xf32, #tpu.memory_space<vmem>>, vector<16x128xf32>
    %cst = arith.constant 1.000000e-07 : f32
    %cst_4 = arith.constant 0.99999988 : f32
    %5 = vector.broadcast %cst : f32 to vector<16x128xf32>
    %6 = arith.maximumf %5, %3 : vector<16x128xf32>
    %7 = vector.broadcast %cst_4 : f32 to vector<16x128xf32>
    %8 = arith.minimumf %7, %6 : vector<16x128xf32>
    %cst_5 = arith.constant 1.000000e+00 : f32
    %9 = vector.broadcast %cst_5 : f32 to vector<16x128xf32>
    %10 = arith.subf %9, %4 : vector<16x128xf32>
    %cst_6 = arith.constant 5.000000e-01 : f32
    %11 = vector.broadcast %cst_6 : f32 to vector<16x128xf32>
    %12 = arith.mulf %11, %10 : vector<16x128xf32>
    %cst_7 = arith.constant 1.000000e+00 : f32
    %13 = vector.broadcast %cst_7 : f32 to vector<16x128xf32>
    %14 = arith.subf %13, %8 : vector<16x128xf32>
    %15 = math.log %14 : vector<16x128xf32>
    %16 = arith.mulf %12, %15 : vector<16x128xf32>
    %cst_8 = arith.constant 2.000000e+00 : f32
    %17 = vector.broadcast %cst_8 : f32 to vector<16x128xf32>
    %18 = arith.mulf %17, %4 : vector<16x128xf32>
    %19 = math.log %8 : vector<16x128xf32>
    %20 = arith.mulf %18, %19 : vector<16x128xf32>
    %21 = arith.addf %16, %20 : vector<16x128xf32>
    %c0_9 = arith.constant 0 : index
    %c0_10 = arith.constant 0 : index
    %22 = vector.load %arg5[%c0_9, %c0_10] : memref<8x128xf32, #tpu.memory_space<vmem>>, vector<8x128xf32>
    %23 = vector.shape_cast %21 : vector<16x128xf32> to vector<2x8x128xf32>
    %cst_11 = arith.constant dense<0.000000e+00> : vector<8x128xf32>
    %24 = vector.multi_reduction <add>, %23, %cst_11 [0] : vector<2x8x128xf32> to vector<8x128xf32>
    %25 = arith.addf %22, %24 : vector<8x128xf32>
    %c0_12 = arith.constant 0 : index
    %c0_13 = arith.constant 0 : index
    %26 = vector.load %arg5[%c0_12, %c0_13] : memref<8x128xf32, #tpu.memory_space<vmem>>, vector<8x128xf32>
    tpu.vector_store %arg5[%c0_12, %c0_13], %25 {strides = array<i32>} : memref<8x128xf32, #tpu.memory_space<vmem>>, vector<8x128xf32>,
    %c0_i32_14 = arith.constant 0 : i32
    %27 = arith.cmpi eq, %arg1, %c0_i32_14 : i32
    %28 = arith.extui %27 : i1 to i32
    %c0_i32_15 = arith.constant 0 : i32
    %29 = arith.cmpi ne, %28, %c0_i32_15 : i32
    scf.if %29 {
      %c0_16 = arith.constant 0 : index
      %c0_17 = arith.constant 0 : index
      %30 = vector.load %arg5[%c0_16, %c0_17] : memref<8x128xf32, #tpu.memory_space<vmem>>, vector<8x128xf32>
      %c0_18 = arith.constant 0 : index
      %c0_19 = arith.constant 0 : index
      %31 = vector.load %arg4[%c0_18, %c0_19] : memref<8x128xf32, #tpu.memory_space<vmem>>, vector<8x128xf32>
      tpu.vector_store %arg4[%c0_18, %c0_19], %30 {strides = array<i32>} : memref<8x128xf32, #tpu.memory_space<vmem>>, vector<8x128xf32>,
    } else {
    }
    return
  }
  func.func @transform_0(%arg0: i32, %arg1: i32) -> (i32, i32) {
    %c1_i32 = arith.constant 1 : i32
    %0 = arith.muli %arg0, %c1_i32 : i32
    %1 = arith.addi %0, %arg1 : i32
    %c0_i32 = arith.constant 0 : i32
    %c0_i32_0 = arith.constant 0 : i32
    return %1, %c0_i32 : i32, i32
  }
  func.func @transform_1(%arg0: i32, %arg1: i32) -> (i32, i32) {
    %c1_i32 = arith.constant 1 : i32
    %0 = arith.muli %arg0, %c1_i32 : i32
    %1 = arith.addi %0, %arg1 : i32
    %c0_i32 = arith.constant 0 : i32
    %c0_i32_0 = arith.constant 0 : i32
    return %1, %c0_i32 : i32, i32
  }
  func.func @transform_2(%arg0: i32, %arg1: i32) -> (i32, i32) {
    %c0_i32 = arith.constant 0 : i32
    %c0_i32_0 = arith.constant 0 : i32
    return %arg0, %c0_i32 : i32, i32
  }
}

</mosaic_0001>

<bundles_post_ra>
// kernel: tpu_custom_call.1
= control target key start
LH: loop header
LB: loop body
LE: loop exit
PB: predicated region body
PF: predicated region fallthrough
CT: control target
= control target key end

     0   :  { %7 = vsyncpa [#allocation4], 0  ;;  %s253_s0 = inlined_call_operand.hbm [shape: f32[16,128], index: 0, kind: input, shape index: {}]   ;;  %s254_s1 = inlined_call_operand.hbm [shape: f32[16,128], index: 1, kind: input, shape index: {}]   ;;  %s255_s2 = inlined_call_operand.hbm [shape: f32[8,128], index: 2, kind: output, shape index: {}]  }
   0x1   :  { %8 = vsyncpa [#allocation7], 0 }
   0x2   :  { %9 = vsyncpa [#allocation5], 0  ;;  %s197_s9 = smov [#allocation3]   ;;  %s125_s13 = scalar_lea.hbm %s253_s0, 256 }
   0x3   :  { %s19_s10 = sshll.u32 %s197_s9, 4  ;;  %p126_p0 = scmp.ne.s32.totalorder %s253_s0, %s125_s13  ;;  %s20_s10 = int_to_ptr.vmem [resolvable:$true] %s19_s10 }
   0x4   :  { %p129_p1 = scmp.lt.u32.totalorder %s125_s13, %s253_s0 }
   0x6   :  { %p131_p2 = pnand %p129_p1, %p126_p0 }
   0x8   :  { %134 = shalt.err (!%p131_p2)
}
   0x9   :  { %s135_s18 = scalar_lea.vmem %s20_s10, 256  ;;  %p140_p4 = scmp.lt.s32.totalorder %s20_s10, %s20_s10 }
   0xa   :  { %p136_p3 = scmp.ne.s32.totalorder %s20_s10, %s135_s18  ;;  %p141_p5 = scmp.lt.s32.totalorder %s135_s18, %s135_s18 }
   0xc   :  { %p142_p6 = por %p141_p5, %p140_p4 }
   0xe   :  { %p143_p7 = pnand %p142_p6, %p136_p3 }
  0x10   :  { %146 = shalt.err (!%p143_p7)
}
  0x11   :  { %s198_s19 = smov 128   ;;  %s199_s20 = smov 8  }
  0x12   :  { %25 = dma.hbm_to_vmem [thread:$0]  %s253_s0, 256, %s20_s10, [#allocation4], %s198_s19, %s198_s19, %s199_s20  }
  0x13   :  { %s200_s23 = smov [#allocation6]   ;;  %s147_s27 = scalar_lea.hbm %s254_s1, 256 }
  0x14   :  { %s35_s24 = sshll.u32 %s200_s23, 4  ;;  %p148_p8 = scmp.ne.s32.totalorder %s254_s1, %s147_s27  ;;  %s36_s24 = int_to_ptr.vmem [resolvable:$true] %s35_s24 }
  0x15   :  { %p151_p9 = scmp.lt.u32.totalorder %s147_s27, %s254_s1 }
  0x17   :  { %p153_p10 = pnand %p151_p9, %p148_p8 }
  0x19   :  { %156 = shalt.err (!%p153_p10)
}
  0x1a   :  { %s157_s4 = scalar_lea.vmem %s36_s24, 256  ;;  %p162_p12 = scmp.lt.s32.totalorder %s36_s24, %s36_s24 }
  0x1b   :  { %p158_p11 = scmp.ne.s32.totalorder %s36_s24, %s157_s4  ;;  %p163_p13 = scmp.lt.s32.totalorder %s157_s4, %s157_s4 }
  0x1d   :  { %p164_p0 = por %p163_p13, %p162_p12 }
  0x1f   :  { %p165_p1 = pnand %p164_p0, %p158_p11 }
  0x21   :  { %168 = shalt.err (!%p165_p1)
}
  0x22   :  { %41 = dma.hbm_to_vmem [thread:$0]  %s254_s1, 256, %s36_s24, [#allocation7], %s198_s19, %s198_s19, %s199_s20  }
  0x23   :  { %191 = dma.done.wait [#allocation4], 256  }
  0x24   :  { %192 = vsyncadd [#allocation4], 4294967040 }
  0x25   :  { %193 = dma.done.wait [#allocation7], 256  }
  0x26   :  { %194 = vsyncadd [#allocation7], 4294967040  ;;  %v57_v0 = vld [vmem:[#allocation3] sm:$0xff]  ;;  %v58_v1 = vld [vmem:[#allocation3 + $0x8] sm:$0xff]  ;;  %s201_s1 = smov [#allocation8]  }
  0x27   :  { %v61_v2 = vmax.f32 %v57_v0, 1e-07  ;;  %v62_v3 = vmax.f32 %v58_v1, 1e-07  ;;  %v59_v8 = vld [vmem:[#allocation6] sm:$0xff]  ;;  %v60_v9 = vld [vmem:[#allocation6 + $0x8] sm:$0xff] }
  0x28   :  { %v65_v10 = vsub.f32 1.0, %v59_v8  ;;  %v66_v11 = vsub.f32 1.0, %v60_v9  ;;  %v77_v12 = vmul.f32 2.0, %v59_v8  ;;  %v78_v14 = vmul.f32 2.0, %v60_v9  ;;  %s102_s6 = sshll.u32 %s201_s1, 4  ;;  %s103_s6 = int_to_ptr.vmem [resolvable:$true] %s102_s6 }
  0x29   :  { %v63_v4 = vmin.f32 %v61_v2, 0.9999999  ;;  %v64_v5 = vmin.f32 %v62_v3, 0.9999999  ;;  %s169_s7 = scalar_lea.vmem %s103_s6, 128  ;;  %p174_p3 = scmp.lt.s32.totalorder %s103_s6, %s103_s6 }
  0x2a   :  { %v67_v16 = vmul.f32 0.5, %v65_v10  ;;  %v68_v19 = vmul.f32 0.5, %v66_v11  ;;  %p170_p2 = scmp.ne.s32.totalorder %s103_s6, %s169_s7  ;;  %p175_p4 = scmp.lt.s32.totalorder %s169_s7, %s169_s7 }
  0x2b   :  { %v69_v6 = vsub.f32 1.0, %v63_v4  ;;  %v70_v7 = vsub.f32 1.0, %v64_v5  ;;  %117 = vlog2.f32 %v63_v4 }
  0x2c   :  { %119 = vlog2.f32 %v64_v5  ;;  %p176_p5 = por %p175_p4, %p174_p3 }
  0x2d   :  { %121 = vlog2.f32 %v69_v6 }
  0x2e   :  { %123 = vlog2.f32 %v70_v7  ;;  %p177_p6 = pnand %p176_p5, %p170_p2 }
  0x35   :  { %v118_v13 = vpop.eup %117 }
  0x36   :  { %v120_v15 = vpop.eup %119  ;;  %v80_v17 = vmul.f32 0.6931472, %v118_v13 }
  0x37   :  { %v122_v18 = vpop.eup %121  ;;  %v82_v20 = vmul.f32 0.6931472, %v120_v15 }
  0x38   :  { %v124_v21 = vpop.eup %123  ;;  %v72_v22 = vmul.f32 0.6931472, %v122_v18  ;;  %v83_v23 = vmul.f32 %v80_v17, %v77_v12 }
  0x39   :  { %v74_v24 = vmul.f32 0.6931472, %v124_v21  ;;  %v84_v25 = vmul.f32 %v82_v20, %v78_v14 }
  0x3a   :  { %v75_v26 = vmul.f32 %v72_v22, %v67_v16 }
  0x3b   :  { %v76_v27 = vmul.f32 %v74_v24, %v68_v19 }
  0x3c   :  { %v85_v28 = vadd.f32 %v83_v23, %v75_v26 }
  0x3d   :  { %v86_v29 = vadd.f32 %v84_v25, %v76_v27 }
  0x3f   :  { %v88_v30 = vadd.f32 %v86_v29, %v85_v28 }
  0x41   :  { %95 = vst [vmem:[#allocation8] sm:$0xff] %v88_v30 }
  0x42   :  { %180 = shalt.err (!%p177_p6)
}
  0x43   :  { %s181_s10 = scalar_lea.hbm %s255_s2, 128 }
  0x44   :  { %p182_p7 = scmp.ne.s32.totalorder %s255_s2, %s181_s10  ;;  %p185_p8 = scmp.lt.u32.totalorder %s181_s10, %s255_s2 }
  0x46   :  { %p187_p9 = pnand %p185_p8, %p182_p7 }
  0x48   :  { %190 = shalt.err (!%p187_p9)
}
  0x49   :  { %105 = dma.vmem_to_hbm [thread:$0]  %s103_s6, 128, %s255_s2, [#allocation5]  }
  0x4a   :  { %195 = dma.done.wait [#allocation5], 128  }
  0x4b   :  { %196 = vsyncadd [#allocation5], 4294967168 }
  0x4c   :  { %109 = vsyncpa [#allocation4], 1 }
  0x4d   :  { %110 = vsyncpa [#allocation7], 1 }
  0x4e   :  { %111 = vsyncpa [#allocation5], 1 }

</bundles_post_ra>
